<compile_context>
chip_gen: v7x
topology: tpu7x:2x2x1
jax: 0.10.0
libtpu: 0.0.40
codegen_flags: <defaults>
</compile_context>

<pallas_src>
import jax
import jax.numpy as jnp
from jax.experimental import pallas as pl
from jax.experimental.pallas import tpu as pltpu

_LANES = 128
_SUBLANES = 8
_MAX_TILE_ROWS = 2048  # 2048 * 128 * 4 B = 1 MiB per f32 input tile


def _round_up(a, b):
    return ((a + b - 1) // b) * b


def _pearson_moments_kernel(x_ref, y_ref, acc_ref):
    """Accumulate raw moments of one (TR, 128) tile into acc_ref (5, 8, 128).

    acc_ref slots: [sum_x, sum_y, sum_xy, sum_xx, sum_yy], each kept as an
    (8, 128) sublane/lane-shaped partial so per-tile work is pure VPU adds;
    the cross-lane collapse happens once, outside the kernel.
    """
    t = pl.program_id(1)

    x = x_ref[...].astype(jnp.float32)  # x = target (matches PyTorch forward)
    y = y_ref[...].astype(jnp.float32)  # y = pred
    tr = x.shape[0]
    xr = x.reshape(tr // _SUBLANES, _SUBLANES, _LANES)
    yr = y.reshape(tr // _SUBLANES, _SUBLANES, _LANES)

    sx = jnp.sum(xr, axis=0)
    sy = jnp.sum(yr, axis=0)
    sxy = jnp.sum(xr * yr, axis=0)
    sxx = jnp.sum(xr * xr, axis=0)
    syy = jnp.sum(yr * yr, axis=0)

    @pl.when(t == 0)
    def _():
        acc_ref[...] = jnp.zeros_like(acc_ref)

    acc_ref[0] += sx
    acc_ref[1] += sy
    acc_ref[2] += sxy
    acc_ref[3] += sxx
    acc_ref[4] += syy


def pearson_correlation_loss(pred, target):
    """Returns 1 - r^2 where r is the Pearson correlation over all elements."""
    assert pred.shape == target.shape, "pred/target shape mismatch"
    n = int(pred.size)
    assert n > 0

    # ---- lane-dense layout + tiling -------------------------------------
    rows_needed = -(-n // _LANES)                                   # ceil(n/128)
    tile_rows = min(_MAX_TILE_ROWS, _round_up(rows_needed, _SUBLANES))
    num_tiles = -(-rows_needed // tile_rows)
    # Split the row range across (up to) 2 TensorCores for v7x; harmless elsewhere.
    num_shards = 2 if num_tiles >= 2 else 1
    tiles_per_shard = -(-num_tiles // num_shards)
    total_rows = num_shards * tiles_per_shard * tile_rows
    padded = total_rows * _LANES

    xf = jnp.ravel(target)  # x = target
    yf = jnp.ravel(pred)    # y = pred
    if padded > n:
        # Exact: zero padding contributes nothing to raw moments; divide by true n.
        xf = jnp.pad(xf, (0, padded - n))
        yf = jnp.pad(yf, (0, padded - n))
    x2d = xf.reshape(total_rows, _LANES)
    y2d = yf.reshape(total_rows, _LANES)

    itemsize = x2d.dtype.itemsize
    in_tile_bytes = tile_rows * _LANES * itemsize
    vmem_limit = int(2 * 2 * in_tile_bytes + (4 << 20))  # 2 inputs x 2 buffers + slack

    row_map = lambda c, t: (c * tiles_per_shard + t, 0)

    partials = pl.pallas_call(
        _pearson_moments_kernel,
        out_shape=jax.ShapeDtypeStruct((num_shards, 5, _SUBLANES, _LANES), jnp.float32),
        grid=(num_shards, tiles_per_shard),
        in_specs=[
            pl.BlockSpec((tile_rows, _LANES), row_map),
            pl.BlockSpec((tile_rows, _LANES), row_map),
        ],
        out_specs=pl.BlockSpec((None, 5, _SUBLANES, _LANES), lambda c, t: (c, 0, 0, 0)),
        compiler_params=pltpu.CompilerParams(
            dimension_semantics=("parallel", "arbitrary"),
            vmem_limit_bytes=vmem_limit,
        ),
        cost_estimate=pl.CostEstimate(
            flops=10 * padded,
            transcendentals=0,
            bytes_accessed=2 * padded * itemsize + num_shards * 5 * _SUBLANES * _LANES * 4,
        ),
    )(x2d, y2d)

    # ---- tiny epilogue: collapse (shards, 5, 8, 128) -> 5 scalars --------
    sums = jnp.sum(partials, axis=(0, 2, 3))  # (5,) f32
    s_x, s_y, s_xy, s_xx, s_yy = sums[0], sums[1], sums[2], sums[3], sums[4]
    n_f = jnp.float32(n)
    mx = s_x / n_f
    my = s_y / n_f
    r_num = s_xy - n_f * mx * my                     # sum((x-mx)*(y-my))
    var_x = jnp.maximum(s_xx - n_f * mx * mx, 0.0)   # sum((x-mx)^2), clamp fp noise
    var_y = jnp.maximum(s_yy - n_f * my * my, 0.0)   # sum((y-my)^2)
    r_den = jnp.sqrt(var_x * var_y) + 1e-05
    r = jnp.clip(r_num / r_den, -1.0, 1.0)
    return 1.0 - r * r


if __name__ == "__main__":
    key = jax.random.PRNGKey(0)
    k1, k2 = jax.random.split(key)
    # Small shapes consistent with a generic prediction/target pair.
    pred = jax.random.normal(k1, (2, 4, 16, 16), dtype=jnp.float32)
    target = 0.7 * pred + 0.3 * jax.random.normal(k2, (2, 4, 16, 16), dtype=jnp.float32)

    loss = pearson_correlation_loss(pred, target)
    jax.block_until_ready(loss)

    # Pure-JAX two-pass reference (same math as the PyTorch module).
    x, y = target, pred
    mx, my = jnp.mean(x), jnp.mean(y)
    xm, ym = x - mx, y - my
    r = jnp.sum(xm * ym) / (jnp.sqrt(jnp.sum(xm ** 2) * jnp.sum(ym ** 2)) + 1e-05)
    ref = 1.0 - jnp.clip(r, -1.0, 1.0) ** 2
    assert jnp.allclose(loss, ref, atol=2e-5, rtol=1e-4), (loss, ref)

    print("KERNEL_OK")
</pallas_src>

<mosaic_0001>
module attributes {stable_mosaic.version = 11 : i64} {
  func.func @_pearson_moments_kernel(%arg0: i32, %arg1: i32, %arg2: memref<16x128xf32, #tpu.memory_space<vmem>>, %arg3: memref<16x128xf32, #tpu.memory_space<vmem>>, %arg4: memref<1x5x8x128xf32, #tpu.memory_space<vmem>>) attributes {dimension_semantics = [#tpu.dimension_semantics<parallel>, #tpu.dimension_semantics<arbitrary>], iteration_bounds = array<i64: 1, 1>, scalar_prefetch = 0 : i64, scratch_operands = 0 : i64, tpu.core_type = #tpu.core_type<tc>, window_params = [{transform_indices = @transform_0, window_bounds = array<i64: 16, 128>}, {transform_indices = @transform_1, window_bounds = array<i64: 16, 128>}, {transform_indices = @transform_2, window_bounds = array<i64: 1, 5, 8, 128>}]} {
    %c0 = arith.constant 0 : index
    %c0_0 = arith.constant 0 : index
    %0 = vector.load %arg2[%c0, %c0_0] : memref<16x128xf32, #tpu.memory_space<vmem>>, vector<16x128xf32>
    %c0_1 = arith.constant 0 : index
    %c0_2 = arith.constant 0 : index
    %1 = vector.load %arg3[%c0_1, %c0_2] : memref<16x128xf32, #tpu.memory_space<vmem>>, vector<16x128xf32>
    %2 = vector.shape_cast %0 : vector<16x128xf32> to vector<2x8x128xf32>
    %3 = vector.shape_cast %1 : vector<16x128xf32> to vector<2x8x128xf32>
    %cst = arith.constant dense<0.000000e+00> : vector<8x128xf32>
    %4 = vector.multi_reduction <add>, %2, %cst [0] : vector<2x8x128xf32> to vector<8x128xf32>
    %cst_3 = arith.constant dense<0.000000e+00> : vector<8x128xf32>
    %5 = vector.multi_reduction <add>, %3, %cst_3 [0] : vector<2x8x128xf32> to vector<8x128xf32>
    %6 = arith.mulf %2, %3 : vector<2x8x128xf32>
    %cst_4 = arith.constant dense<0.000000e+00> : vector<8x128xf32>
    %7 = vector.multi_reduction <add>, %6, %cst_4 [0] : vector<2x8x128xf32> to vector<8x128xf32>
    %8 = arith.mulf %2, %2 : vector<2x8x128xf32>
    %cst_5 = arith.constant dense<0.000000e+00> : vector<8x128xf32>
    %9 = vector.multi_reduction <add>, %8, %cst_5 [0] : vector<2x8x128xf32> to vector<8x128xf32>
    %10 = arith.mulf %3, %3 : vector<2x8x128xf32>
    %cst_6 = arith.constant dense<0.000000e+00> : vector<8x128xf32>
    %11 = vector.multi_reduction <add>, %10, %cst_6 [0] : vector<2x8x128xf32> to vector<8x128xf32>
    %c0_i32 = arith.constant 0 : i32
    %12 = arith.cmpi eq, %arg1, %c0_i32 : i32
    %13 = arith.extui %12 : i1 to i32
    %c0_i32_7 = arith.constant 0 : i32
    %14 = arith.cmpi ne, %13, %c0_i32_7 : i32
    scf.if %14 {
      %cst_44 = arith.constant 0.000000e+00 : f32
      %45 = vector.broadcast %cst_44 : f32 to vector<5x8x128xf32>
      %c0_45 = arith.constant 0 : index
      %c0_46 = arith.constant 0 : index
      %c0_47 = arith.constant 0 : index
      %c0_48 = arith.constant 0 : index
      %46 = vector.load %arg4[%c0_45, %c0_46, %c0_47, %c0_48] : memref<1x5x8x128xf32, #tpu.memory_space<vmem>>, vector<1x5x8x128xf32>
      %47 = vector.shape_cast %46 : vector<1x5x8x128xf32> to vector<5x8x128xf32>
      %48 = vector.shape_cast %45 : vector<5x8x128xf32> to vector<1x5x8x128xf32>
      tpu.vector_store %arg4[%c0_45, %c0_46, %c0_47, %c0_48], %48 {strides = array<i32>} : memref<1x5x8x128xf32, #tpu.memory_space<vmem>>, vector<1x5x8x128xf32>,
    } else {
    }
    %c0_8 = arith.constant 0 : index
    %c0_9 = arith.constant 0 : index
    %c0_10 = arith.constant 0 : index
    %c0_11 = arith.constant 0 : index
    %15 = vector.load %arg4[%c0_8, %c0_9, %c0_10, %c0_11] : memref<1x5x8x128xf32, #tpu.memory_space<vmem>>, vector<1x1x8x128xf32>
    %16 = vector.shape_cast %15 : vector<1x1x8x128xf32> to vector<8x128xf32>
    %17 = arith.addf %16, %4 : vector<8x128xf32>
    %c0_12 = arith.constant 0 : index
    %c0_13 = arith.constant 0 : index
    %c0_14 = arith.constant 0 : index
    %c0_15 = arith.constant 0 : index
    %18 = vector.load %arg4[%c0_12, %c0_13, %c0_14, %c0_15] : memref<1x5x8x128xf32, #tpu.memory_space<vmem>>, vector<1x1x8x128xf32>
    %19 = vector.shape_cast %18 : vector<1x1x8x128xf32> to vector<8x128xf32>
    %20 = vector.shape_cast %17 : vector<8x128xf32> to vector<1x1x8x128xf32>
    tpu.vector_store %arg4[%c0_12, %c0_13, %c0_14, %c0_15], %20 {strides = array<i32>} : memref<1x5x8x128xf32, #tpu.memory_space<vmem>>, vector<1x1x8x128xf32>,
    %c0_16 = arith.constant 0 : index
    %c1 = arith.constant 1 : index
    %c0_17 = arith.constant 0 : index
    %c0_18 = arith.constant 0 : index
    %21 = vector.load %arg4[%c0_16, %c1, %c0_17, %c0_18] : memref<1x5x8x128xf32, #tpu.memory_space<vmem>>, vector<1x1x8x128xf32>
    %22 = vector.shape_cast %21 : vector<1x1x8x128xf32> to vector<8x128xf32>
    %23 = arith.addf %22, %5 : vector<8x128xf32>
    %c0_19 = arith.constant 0 : index
    %c1_20 = arith.constant 1 : index
    %c0_21 = arith.constant 0 : index
    %c0_22 = arith.constant 0 : index
    %24 = vector.load %arg4[%c0_19, %c1_20, %c0_21, %c0_22] : memref<1x5x8x128xf32, #tpu.memory_space<vmem>>, vector<1x1x8x128xf32>
    %25 = vector.shape_cast %24 : vector<1x1x8x128xf32> to vector<8x128xf32>
    %26 = vector.shape_cast %23 : vector<8x128xf32> to vector<1x1x8x128xf32>
    tpu.vector_store %arg4[%c0_19, %c1_20, %c0_21, %c0_22], %26 {strides = array<i32>} : memref<1x5x8x128xf32, #tpu.memory_space<vmem>>, vector<1x1x8x128xf32>,
    %c0_23 = arith.constant 0 : index
    %c2 = arith.constant 2 : index
    %c0_24 = arith.constant 0 : index
    %c0_25 = arith.constant 0 : index
    %27 = vector.load %arg4[%c0_23, %c2, %c0_24, %c0_25] : memref<1x5x8x128xf32, #tpu.memory_space<vmem>>, vector<1x1x8x128xf32>
    %28 = vector.shape_cast %27 : vector<1x1x8x128xf32> to vector<8x128xf32>
    %29 = arith.addf %28, %7 : vector<8x128xf32>
    %c0_26 = arith.constant 0 : index
    %c2_27 = arith.constant 2 : index
    %c0_28 = arith.constant 0 : index
    %c0_29 = arith.constant 0 : index
    %30 = vector.load %arg4[%c0_26, %c2_27, %c0_28, %c0_29] : memref<1x5x8x128xf32, #tpu.memory_space<vmem>>, vector<1x1x8x128xf32>
    %31 = vector.shape_cast %30 : vector<1x1x8x128xf32> to vector<8x128xf32>
    %32 = vector.shape_cast %29 : vector<8x128xf32> to vector<1x1x8x128xf32>
    tpu.vector_store %arg4[%c0_26, %c2_27, %c0_28, %c0_29], %32 {strides = array<i32>} : memref<1x5x8x128xf32, #tpu.memory_space<vmem>>, vector<1x1x8x128xf32>,
    %c0_30 = arith.constant 0 : index
    %c3 = arith.constant 3 : index
    %c0_31 = arith.constant 0 : index
    %c0_32 = arith.constant 0 : index
    %33 = vector.load %arg4[%c0_30, %c3, %c0_31, %c0_32] : memref<1x5x8x128xf32, #tpu.memory_space<vmem>>, vector<1x1x8x128xf32>
    %34 = vector.shape_cast %33 : vector<1x1x8x128xf32> to vector<8x128xf32>
    %35 = arith.addf %34, %9 : vector<8x128xf32>
    %c0_33 = arith.constant 0 : index
    %c3_34 = arith.constant 3 : index
    %c0_35 = arith.constant 0 : index
    %c0_36 = arith.constant 0 : index
    %36 = vector.load %arg4[%c0_33, %c3_34, %c0_35, %c0_36] : memref<1x5x8x128xf32, #tpu.memory_space<vmem>>, vector<1x1x8x128xf32>
    %37 = vector.shape_cast %36 : vector<1x1x8x128xf32> to vector<8x128xf32>
    %38 = vector.shape_cast %35 : vector<8x128xf32> to vector<1x1x8x128xf32>
    tpu.vector_store %arg4[%c0_33, %c3_34, %c0_35, %c0_36], %38 {strides = array<i32>} : memref<1x5x8x128xf32, #tpu.memory_space<vmem>>, vector<1x1x8x128xf32>,
    %c0_37 = arith.constant 0 : index
    %c4 = arith.constant 4 : index
    %c0_38 = arith.constant 0 : index
    %c0_39 = arith.constant 0 : index
    %39 = vector.load %arg4[%c0_37, %c4, %c0_38, %c0_39] : memref<1x5x8x128xf32, #tpu.memory_space<vmem>>, vector<1x1x8x128xf32>
    %40 = vector.shape_cast %39 : vector<1x1x8x128xf32> to vector<8x128xf32>
    %41 = arith.addf %40, %11 : vector<8x128xf32>
    %c0_40 = arith.constant 0 : index
    %c4_41 = arith.constant 4 : index
    %c0_42 = arith.constant 0 : index
    %c0_43 = arith.constant 0 : index
    %42 = vector.load %arg4[%c0_40, %c4_41, %c0_42, %c0_43] : memref<1x5x8x128xf32, #tpu.memory_space<vmem>>, vector<1x1x8x128xf32>
    %43 = vector.shape_cast %42 : vector<1x1x8x128xf32> to vector<8x128xf32>
    %44 = vector.shape_cast %41 : vector<8x128xf32> to vector<1x1x8x128xf32>
    tpu.vector_store %arg4[%c0_40, %c4_41, %c0_42, %c0_43], %44 {strides = array<i32>} : memref<1x5x8x128xf32, #tpu.memory_space<vmem>>, vector<1x1x8x128xf32>,
    return
  }
  func.func @transform_0(%arg0: i32, %arg1: i32) -> (i32, i32) {
    %c1_i32 = arith.constant 1 : i32
    %0 = arith.muli %arg0, %c1_i32 : i32
    %1 = arith.addi %0, %arg1 : i32
    %c0_i32 = arith.constant 0 : i32
    %c0_i32_0 = arith.constant 0 : i32
    return %1, %c0_i32 : i32, i32
  }
  func.func @transform_1(%arg0: i32, %arg1: i32) -> (i32, i32) {
    %c1_i32 = arith.constant 1 : i32
    %0 = arith.muli %arg0, %c1_i32 : i32
    %1 = arith.addi %0, %arg1 : i32
    %c0_i32 = arith.constant 0 : i32
    %c0_i32_0 = arith.constant 0 : i32
    return %1, %c0_i32 : i32, i32
  }
  func.func @transform_2(%arg0: i32, %arg1: i32) -> (i32, i32, i32, i32) {
    %c0_i32 = arith.constant 0 : i32
    %c0_i32_0 = arith.constant 0 : i32
    %c0_i32_1 = arith.constant 0 : i32
    %c0_i32_2 = arith.constant 0 : i32
    return %arg0, %c0_i32, %c0_i32_0, %c0_i32_1 : i32, i32, i32, i32
  }
}

</mosaic_0001>

<bundles_post_ra>
// kernel: tpu_custom_call.1
= control target key start
LH: loop header
LB: loop body
LE: loop exit
PB: predicated region body
PF: predicated region fallthrough
CT: control target
= control target key end

     0   :  { %7 = vsyncpa [#allocation3], 0  ;;  %s256_s0 = inlined_call_operand.hbm [shape: f32[16,128], index: 0, kind: input, shape index: {}]   ;;  %s257_s1 = inlined_call_operand.hbm [shape: f32[16,128], index: 1, kind: input, shape index: {}]   ;;  %s258_s2 = inlined_call_operand.hbm [shape: f32[1,5,8,128], index: 2, kind: output, shape index: {}]  }
   0x1   :  { %8 = vsyncpa [#allocation6], 0 }
   0x2   :  { %9 = vsyncpa [#allocation4], 0  ;;  %s191_s9 = smov [#allocation2]   ;;  %s119_s13 = scalar_lea.hbm %s256_s0, 256 }
   0x3   :  { %s19_s10 = sshll.u32 %s191_s9, 4  ;;  %p120_p0 = scmp.ne.s32.totalorder %s256_s0, %s119_s13  ;;  %s20_s10 = int_to_ptr.vmem [resolvable:$true] %s19_s10 }
   0x4   :  { %p123_p1 = scmp.lt.u32.totalorder %s119_s13, %s256_s0 }
   0x6   :  { %p125_p2 = pnand %p123_p1, %p120_p0 }
   0x8   :  { %128 = shalt.err (!%p125_p2)
}
   0x9   :  { %s129_s18 = scalar_lea.vmem %s20_s10, 256  ;;  %p134_p4 = scmp.lt.s32.totalorder %s20_s10, %s20_s10 }
   0xa   :  { %p130_p3 = scmp.ne.s32.totalorder %s20_s10, %s129_s18  ;;  %p135_p5 = scmp.lt.s32.totalorder %s129_s18, %s129_s18 }
   0xc   :  { %p136_p6 = por %p135_p5, %p134_p4 }
   0xe   :  { %p137_p7 = pnand %p136_p6, %p130_p3 }
  0x10   :  { %140 = shalt.err (!%p137_p7)
}
  0x11   :  { %s192_s19 = smov 128   ;;  %s193_s20 = smov 8  }
  0x12   :  { %25 = dma.hbm_to_vmem [thread:$0]  %s256_s0, 256, %s20_s10, [#allocation3], %s192_s19, %s192_s19, %s193_s20  }
  0x13   :  { %s194_s23 = smov [#allocation5]   ;;  %s141_s27 = scalar_lea.hbm %s257_s1, 256 }
  0x14   :  { %s35_s24 = sshll.u32 %s194_s23, 4  ;;  %p142_p8 = scmp.ne.s32.totalorder %s257_s1, %s141_s27  ;;  %s36_s24 = int_to_ptr.vmem [resolvable:$true] %s35_s24 }
  0x15   :  { %p145_p9 = scmp.lt.u32.totalorder %s141_s27, %s257_s1 }
  0x17   :  { %p147_p10 = pnand %p145_p9, %p142_p8 }
  0x19   :  { %150 = shalt.err (!%p147_p10)
}
  0x1a   :  { %s151_s4 = scalar_lea.vmem %s36_s24, 256  ;;  %p156_p12 = scmp.lt.s32.totalorder %s36_s24, %s36_s24 }
  0x1b   :  { %p152_p11 = scmp.ne.s32.totalorder %s36_s24, %s151_s4  ;;  %p157_p13 = scmp.lt.s32.totalorder %s151_s4, %s151_s4 }
  0x1d   :  { %p158_p0 = por %p157_p13, %p156_p12 }
  0x1f   :  { %p159_p1 = pnand %p158_p0, %p152_p11 }
  0x21   :  { %162 = shalt.err (!%p159_p1)
}
  0x22   :  { %41 = dma.hbm_to_vmem [thread:$0]  %s257_s1, 256, %s36_s24, [#allocation6], %s192_s19, %s192_s19, %s193_s20  }
  0x23   :  { %185 = dma.done.wait [#allocation3], 256  }
  0x24   :  { %186 = vsyncadd [#allocation3], 4294967040 }
  0x25   :  { %187 = dma.done.wait [#allocation6], 256  }
  0x26   :  { %188 = vsyncadd [#allocation6], 4294967040  ;;  %v52_v0 = vld [vmem:[#allocation2] sm:$0xff]  ;;  %v53_v1 = vld [vmem:[#allocation2 + $0x8] sm:$0xff]  ;;  %s195_s6 = smov [#allocation7]  }
  0x27   :  { %v54_v2 = vld [vmem:[#allocation5] sm:$0xff]  ;;  %v56_v3 = vadd.f32 %v53_v1, %v52_v0  ;;  %v55_v4 = vld [vmem:[#allocation5 + $0x8] sm:$0xff]  ;;  %v61_v6 = vmul.f32 %v52_v0, %v52_v0  ;;  %v62_v7 = vmul.f32 %v53_v1, %v53_v1  ;;  %s100_s7 = sshll.u32 %s195_s6, 4  ;;  %s101_s7 = int_to_ptr.vmem [resolvable:$true] %s100_s7 }
  0x28   :  { %v58_v5 = vmul.f32 %v54_v2, %v52_v0  ;;  %v57_v8 = vadd.f32 %v55_v4, %v54_v2  ;;  %v59_v9 = vmul.f32 %v55_v4, %v53_v1  ;;  %v64_v10 = vmul.f32 %v54_v2, %v54_v2  ;;  %s163_s1 = scalar_lea.vmem %s101_s7, 640  ;;  %p168_p3 = scmp.lt.s32.totalorder %s101_s7, %s101_s7 }
  0x29   :  { %v65_v11 = vmul.f32 %v55_v4, %v55_v4  ;;  %v63_v12 = vadd.f32 %v62_v7, %v61_v6  ;;  %78 = vst [vmem:[#allocation7] sm:$0xff] %v56_v3  ;;  %p164_p2 = scmp.ne.s32.totalorder %s101_s7, %s163_s1  ;;  %p169_p4 = scmp.lt.s32.totalorder %s163_s1, %s163_s1 }
  0x2a   :  { %v60_v13 = vadd.f32 %v59_v9, %v58_v5  ;;  %82 = vst [vmem:[#allocation7 + $0x8] sm:$0xff] %v57_v8 }
  0x2b   :  { %v66_v14 = vadd.f32 %v65_v11, %v64_v10  ;;  %90 = vst [vmem:[#allocation7 + $0x18] sm:$0xff] %v63_v12  ;;  %p170_p5 = por %p169_p4, %p168_p3 }
  0x2c   :  { %86 = vst [vmem:[#allocation7 + $0x10] sm:$0xff] %v60_v13 }
  0x2d   :  { %94 = vst [vmem:[#allocation7 + $0x20] sm:$0xff] %v66_v14  ;;  %p171_p6 = pnand %p170_p5, %p164_p2 }
  0x2f   :  { %174 = shalt.err (!%p171_p6)
}
  0x30   :  { %s175_s10 = scalar_lea.hbm %s258_s2, 640 }
  0x31   :  { %p176_p7 = scmp.ne.s32.totalorder %s258_s2, %s175_s10  ;;  %p179_p8 = scmp.lt.u32.totalorder %s175_s10, %s258_s2 }
  0x33   :  { %p181_p9 = pnand %p179_p8, %p176_p7 }
  0x35   :  { %184 = shalt.err (!%p181_p9)
}
  0x36   :  { %106 = dma.vmem_to_hbm [thread:$0]  %s101_s7, 640, %s258_s2, [#allocation4], %s192_s19, %s192_s19, %s193_s20  }
  0x37   :  { %189 = dma.done.wait [#allocation4], 640  }
  0x38   :  { %190 = vsyncadd [#allocation4], 4294966656 }
  0x39   :  { %110 = vsyncpa [#allocation3], 1 }
  0x3a   :  { %111 = vsyncpa [#allocation6], 1 }
  0x3b   :  { %112 = vsyncpa [#allocation4], 1 }

</bundles_post_ra>
